<compile_context>
chip_gen: v7x
topology: tpu7x:2x2x1
jax: 0.10.0
libtpu: 0.0.40
codegen_flags: <defaults>
</compile_context>

<pallas_src>
import jax
import jax.numpy as jnp
from jax.experimental import pallas as pl
from jax.experimental.pallas import tpu as pltpu


def _round_up(n: int, m: int) -> int:
    return ((n + m - 1) // m) * m


def _vmem_capacity_bytes() -> int:
    try:
        return int(pltpu.get_tpu_info().vmem_capacity_bytes)
    except Exception:
        return 64 * 1024 * 1024  # conservative fallback (v7x per-TC VMEM)


def _choose_tile_m(M: int, H: int, itemsize: int):
    """Pick the M-tile: as large as VMEM allows (double-buffered x tile),
    128-aligned, capped at 2048 rows, and <= ~half of M so the grid has at
    least 2 steps (megacore sharding on v7x)."""
    m128 = _round_up(max(M, 1), 128)
    vmem = _vmem_capacity_bytes()
    budget = int(vmem * 0.55)  # cap for 2 * TM * H * itemsize (double buffer)
    tm_cap = max(128, (budget // max(2 * H * itemsize, 1)) // 128 * 128)
    tm = min(2048, tm_cap, m128)
    if m128 >= 256:  # ensure >= 2 tiles whenever M permits
        tm = min(tm, _round_up(m128 // 2, 128))
    return tm, vmem


# ----------------------------------------------------------------------------
# Pallas kernel: one M-tile of  y = x @ w + b   (target_size == 1)
# ----------------------------------------------------------------------------
def _decode_kernel(x_ref, w_ref, b_ref, o_ref):
    # x_ref: (TM, H) VMEM   activations tile (pipelined)
    # w_ref: (H, 1)  VMEM   weight column, resident across the grid
    # b_ref: (1,)    SMEM   scalar bias (f32)
    # o_ref: (1, TM) VMEM   lane-dense output row for this tile
    acc = jnp.dot(x_ref[...], w_ref[...],
                  preferred_element_type=jnp.float32)      # (TM, 1), no big transpose
    acc = acc + b_ref[0]
    # Only the tiny (TM, 1) result is relaid out to lane-major (1, TM).
    o_ref[...] = acc.reshape(1, -1).astype(o_ref.dtype)


def linear_decode(x, w, b, *, tm=None):
    """x: (B, S, H); w: (H, 1); b: (1,).  Returns (B, S, 1)."""
    B, S, H = x.shape
    T = w.shape[-1]
    assert T == 1, "kernel specialized to target_size=1 (module default)"
    M = B * S
    itemsize = jnp.dtype(x.dtype).itemsize

    if tm is None:
        TM, vmem = _choose_tile_m(M, H, itemsize)
    else:
        TM = max(128, _round_up(tm, 128))
        vmem = _vmem_capacity_bytes()

    G = pl.cdiv(M, TM)
    M_pad = G * TM

    x2 = x.reshape(M, H)                       # no padding copy; tail tile reads
                                               # past the end, rows discarded below
    w_col = w.reshape(H, 1).astype(x.dtype)    # natural MXU RHS (K, N=1)
    b1 = jnp.asarray(b, jnp.float32).reshape(1)

    vmem_limit = int(min(vmem, 128 * 1024 * 1024) * 0.9)
    cost = pl.CostEstimate(
        flops=2 * M * H,
        bytes_accessed=M * H * itemsize + H * itemsize + M_pad * itemsize,
        transcendentals=0,
    )

    out = pl.pallas_call(
        _decode_kernel,
        out_shape=jax.ShapeDtypeStruct((1, M_pad), x.dtype),
        grid_spec=pltpu.PrefetchScalarGridSpec(
            num_scalar_prefetch=0,
            grid=(G,),
            in_specs=[
                pl.BlockSpec((TM, H), lambda i: (i, 0)),              # x tile (pipelined)
                pl.BlockSpec((H, 1), lambda i: (0, 0)),               # resident weight col
                pl.BlockSpec(memory_space=pltpu.MemorySpace.SMEM),    # scalar bias
            ],
            out_specs=pl.BlockSpec((1, TM), lambda i: (0, i)),        # lane-dense row
        ),
        compiler_params=pltpu.CompilerParams(
            dimension_semantics=("parallel",),     # shards grid across v7x's 2 TCs
            vmem_limit_bytes=vmem_limit,
        ),
        cost_estimate=cost,
    )(x2, w_col, b1)

    # (1, M_pad) lane-major slab -> (M,) -> (B, S, 1); drops the garbage tail rows.
    return out.reshape(M_pad)[:M].reshape(B, S, T)


# ----------------------------------------------------------------------------
# Decoder module mirror
# ----------------------------------------------------------------------------
class Decoder:
    def __init__(self, hidden_dim=None, target_size=1):
        # Reference __init__ registers no parameters; the implied
        # Linear(hidden_dim, target_size) weights back the demonstrative kernel.
        self.hidden_dim = hidden_dim
        self.target_size = target_size
        if hidden_dim is not None:
            key = jax.random.PRNGKey(0)
            kw, kb = jax.random.split(key)
            bound = 1.0 / (hidden_dim ** 0.5)
            self.w = jax.random.uniform(
                kw, (hidden_dim, target_size), jnp.float32, -bound, bound
            )
            self.b = jax.random.uniform(
                kb, (target_size,), jnp.float32, -bound, bound
            )

    def forward(self):
        # Faithful to the reference: `forward(): pass` -> returns None.
        # TODO(synk): reference forward body is empty; nothing to compute here.
        return None

    def decode(self, x):
        # The implied hot path, run through the Pallas kernel.
        return linear_decode(x, self.w, self.b)


def _check(dec, x, atol=1e-2):
    y = jax.block_until_ready(dec.decode(x))
    M = x.shape[0] * x.shape[1]
    y_ref = jnp.dot(x.reshape(M, -1), dec.w,
                    precision=jax.lax.Precision.HIGHEST) + dec.b
    y_ref = y_ref.reshape(x.shape[0], x.shape[1], dec.target_size)
    assert y.shape == y_ref.shape
    # Loose tolerance covers either MXU f32 path; structural errors are O(1).
    assert jnp.allclose(y, y_ref, atol=atol, rtol=atol), float(
        jnp.max(jnp.abs(y - y_ref))
    )


if __name__ == "__main__":
    key = jax.random.PRNGKey(0)

    # Small case from the module defaults: single tile, M < 128 (edge block).
    batch, seq, hidden, target = 2, 8, 32, 1
    dec = Decoder(hidden_dim=hidden, target_size=target)
    assert dec.forward() is None                  # faithful no-op forward
    x = jax.random.normal(key, (batch, seq, hidden), dtype=jnp.float32)
    _check(dec, x)

    # Multi-tile, non-128-aligned M (exercises the no-pad tail path, G >= 2).
    dec2 = Decoder(hidden_dim=256, target_size=1)
    x2 = jax.random.normal(jax.random.PRNGKey(0), (3, 100, 256), dtype=jnp.float32)
    _check(dec2, x2)

    print("KERNEL_OK")
</pallas_src>

<mosaic_0001>
module attributes {stable_mosaic.version = 11 : i64} {
  func.func @_decode_kernel(%arg0: i32, %arg1: memref<128x32xf32, #tpu.memory_space<vmem>>, %arg2: memref<32x1xf32, #tpu.memory_space<vmem>>, %arg3: memref<1xf32, #tpu.memory_space<smem>>, %arg4: memref<1x128xf32, #tpu.memory_space<vmem>>) attributes {dimension_semantics = [#tpu.dimension_semantics<parallel>], iteration_bounds = array<i64: 1>, scalar_prefetch = 0 : i64, scratch_operands = 0 : i64, tpu.core_type = #tpu.core_type<tc>, window_params = [{transform_indices = @transform_0, window_bounds = array<i64: 128, 32>}, {pipeline_mode = #tpu.pipeline_mode<synchronous>, transform_indices = @transform_1, window_bounds = array<i64: 32, 1>}, {transform_indices = @transform_2, window_bounds = array<i64: 1>}, {transform_indices = @transform_3, window_bounds = array<i64: 1, 128>}]} {
    %c0 = arith.constant 0 : index
    %c0_0 = arith.constant 0 : index
    %0 = vector.load %arg1[%c0, %c0_0] : memref<128x32xf32, #tpu.memory_space<vmem>>, vector<128x32xf32>
    %c0_1 = arith.constant 0 : index
    %c0_2 = arith.constant 0 : index
    %1 = vector.load %arg2[%c0_1, %c0_2] : memref<32x1xf32, #tpu.memory_space<vmem>>, vector<32x1xf32>
    %cst = arith.constant dense<0.000000e+00> : vector<128x1xf32>
    %2 = tpu.matmul %0, %1, %cst {dimension_numbers = #tpu.dot_dimension_numbers<[1], [0], [0], [1], [0, 0, 1, 1], [], []>} : vector<128x32xf32>, vector<32x1xf32>, vector<128x1xf32> -> vector<128x1xf32>
    %c0_3 = arith.constant 0 : index
    %3 = memref.load %arg3[%c0_3] : memref<1xf32, #tpu.memory_space<smem>>
    %4 = vector.broadcast %3 : f32 to vector<128x1xf32>
    %5 = arith.addf %2, %4 : vector<128x1xf32>
    %6 = vector.shape_cast %5 : vector<128x1xf32> to vector<1x128xf32>
    %c0_4 = arith.constant 0 : index
    %c0_5 = arith.constant 0 : index
    %7 = vector.load %arg4[%c0_4, %c0_5] : memref<1x128xf32, #tpu.memory_space<vmem>>, vector<1x128xf32>
    tpu.vector_store %arg4[%c0_4, %c0_5], %6 {strides = array<i32>} : memref<1x128xf32, #tpu.memory_space<vmem>>, vector<1x128xf32>,
    return
  }
  func.func @transform_0(%arg0: i32) -> (i32, i32) {
    %c0_i32 = arith.constant 0 : i32
    %c0_i32_0 = arith.constant 0 : i32
    return %arg0, %c0_i32 : i32, i32
  }
  func.func @transform_1(%arg0: i32) -> (i32, i32) {
    %c0_i32 = arith.constant 0 : i32
    %c0_i32_0 = arith.constant 0 : i32
    %c0_i32_1 = arith.constant 0 : i32
    return %c0_i32, %c0_i32_0 : i32, i32
  }
  func.func @transform_2(%arg0: i32) -> i32 {
    %c0_i32 = arith.constant 0 : i32
    %c0_i32_0 = arith.constant 0 : i32
    return %c0_i32 : i32
  }
  func.func @transform_3(%arg0: i32) -> (i32, i32) {
    %c0_i32 = arith.constant 0 : i32
    %c0_i32_0 = arith.constant 0 : i32
    return %c0_i32, %arg0 : i32, i32
  }
}

</mosaic_0001>

<bundles_post_ra>
// kernel: tpu_custom_call.1
= control target key start
LH: loop header
LB: loop body
LE: loop exit
PB: predicated region body
PF: predicated region fallthrough
CT: control target
= control target key end

     0   :  { %vm38_vm0 = vcmask 261120   ;;  %s668_s0 = inlined_call_operand.vmem [shape: f32[16,32], index: 0, kind: input, shape index: {}]   ;;  %s669_s1 = inlined_call_operand.vmem [shape: f32[32,1], index: 1, kind: input, shape index: {}]   ;;  %s670_s2 = inlined_call_operand.<no memory space> [shape: f32[1], index: 2, kind: input, shape index: {}]   ;;  %s671_s3 = inlined_call_operand.hbm [shape: f32[1,128], index: 3, kind: output, shape index: {}]  }
   0x1   :  { %v32_v0 = vld [vmem:[%s669_s1] sm:$0xff]  ;;  %v33_v1 = vld [vmem:[%s669_s1 + $0x8] sm:$0xff]  ;;  %v34_v2 = vld [vmem:[%s669_s1 + $0x10] sm:$0xff] }
   0x2   :  { %v491_v3 = vpack.c.bf16 %v33_v1, %v32_v0  ;;  %v35_v4 = vld [vmem:[%s669_s1 + $0x18] sm:$0xff]  ;;  %v16_v5 = vld [vmem:[%s668_s0] sm:$0xff] }
   0x3   :  { %v24_v6 = vld [vmem:[%s668_s0 + $0x40] sm:$0xff]  ;;  %v495_v7 = vpack.c.bf16 %v35_v4, %v34_v2  ;;  %467 = vmatprep.mubr.msk.f32.mxu0 %vm38_vm0, %v16_v5 }
   0x4   :  { %479 = vmatprep.mubr.msk.f32.mxu1 %vm38_vm0, %v24_v6  ;;  %492 = vmatprep.subr.bf16.mxu0 %v491_v3 }
   0x5   :  { %499 = vmatprep.subr.bf16.mxu1 %v491_v3  ;;  %494 = vmatpush3.bf16.msra.mxu0 %v491_v3 }
   0x6   :  { %501 = vmatpush3.bf16.msra.mxu1 %v491_v3  ;;  %496 = vmatprep.subr.bf16.mxu0 %v495_v7 }
   0x7   :  { %500 = vmatprep.subr.bf16.mxu1 %v495_v7 }
   0x8   :  { %9 = vsyncpa [#allocation4], 0  ;;  %v17_v8 = vld [vmem:[%s668_s0 + $0x8] sm:$0xff]  ;;  %v18_v10 = vld [vmem:[%s668_s0 + $0x10] sm:$0xff]  ;;  %v531_v22 = vmov 0   ;;  %v37_v23 = vstv %s670_s2  ;;  %v296_v56 = vlaneseq  ;;  %vm307_vm1 = vcmask 130112  }
   0x9   :  { %498 = vmatpush3.bf16.msra.mxu0 %v495_v7  ;;  %v25_v9 = vld [vmem:[%s668_s0 + $0x48] sm:$0xff]  ;;  %v26_v11 = vld [vmem:[%s668_s0 + $0x50] sm:$0xff]  ;;  %v19_v12 = vld [vmem:[%s668_s0 + $0x18] sm:$0xff]  ;;  %506 = vset.pattern.permute.xlu1 %v531_v22  ;;  %vm314_vm2 = vcmask 195712   ;;  %vm321_vm3 = vcmask 261312   ;;  %vm328_vm4 = vcmask 326912  }
   0xa   :  { %502 = vmatpush3.bf16.msra.mxu1 %v495_v7  ;;  %v27_v13 = vld [vmem:[%s668_s0 + $0x58] sm:$0xff]  ;;  %v20_v14 = vld [vmem:[%s668_s0 + $0x20] sm:$0xff]  ;;  %v21_v16 = vld [vmem:[%s668_s0 + $0x28] sm:$0xff]  ;;  %505 = vset.pattern.permute.xlu0 %v531_v22  ;;  %v297_v57 = vand.u32 127, %v296_v56  ;;  %v634_v60 = vshrl.u32 %v296_v56, 7  ;;  %vm335_vm5 = vcmask 392512  }
   0xb   :  { %v28_v15 = vld [vmem:[%s668_s0 + $0x60] sm:$0xff]  ;;  %v29_v17 = vld [vmem:[%s668_s0 + $0x68] sm:$0xff]  ;;  %v22_v18 = vld [vmem:[%s668_s0 + $0x30] sm:$0xff]  ;;  %vm342_vm6 = vcmask 458112   ;;  %vm349_vm7 = vcmask 523712   ;;  %vm356_vm8 = vcmask 589312  }
   0xc   :  { %468 = vmatmul.mubr.msk.f32.vlgmr.msra.gmra.mrb[0].mxu0 %vm38_vm0, %v17_v8  ;;  %v30_v19 = vld [vmem:[%s668_s0 + $0x70] sm:$0xff]  ;;  %v23_v20 = vld [vmem:[%s668_s0 + $0x38] sm:$0xff]  ;;  %v302_v61 = vadd.s32 4294967288, %v297_v57  ;;  %v309_v0 = vadd.s32 4294967280, %v297_v57  ;;  %v300_v1 = vsub.s32 %v297_v57, %v634_v60  ;;  %v316_v3 = vadd.s32 4294967272, %v297_v57 }
   0xd   :  { %480 = vmatmul.mubr.msk.f32.vlgmr.msra.gmra.mrb[0].mxu1 %vm38_vm0, %v25_v9  ;;  %470 = vmatprep.mubr.msk.f32.mxu0 %vm38_vm0, %v18_v10  ;;  %v31_v21 = vld [vmem:[%s668_s0 + $0x78] sm:$0xff]  ;;  %v323_v7 = vadd.s32 4294967264, %v297_v57  ;;  %v330_v9 = vadd.s32 4294967256, %v297_v57  ;;  %v358_v22 = vadd.s32 4294967224, %v297_v57  ;;  %vm363_vm9 = vcmask 654912   ;;  %s532_s0 = smov [#allocation3]  }
   0xe   :  { %482 = vmatprep.mubr.msk.f32.mxu1 %vm38_vm0, %v26_v11  ;;  %v305_v2 = vsub.s32 %v302_v61, %v634_v60  ;;  %v312_v6 = vsub.s32 %v309_v0, %v634_v60  ;;  %v319_v11 = vsub.s32 %v316_v3, %v634_v60  ;;  %vm370_vm10 = vcmask 720512   ;;  %s415_s2 = sshll.u32 %s532_s0, 4  ;;  %s416_s2 = int_to_ptr.vmem [resolvable:$true] %s415_s2 }
   0xf   :  { %vm377_vm11 = vcmask 786112   ;;  %vm384_vm12 = vcmask 851712   ;;  %vm391_vm13 = vcmask 917312   ;;  %vm398_vm14 = vcmask 982912   ;;  %s507_s25 = scalar_lea.vmem %s416_s2, 16  ;;  %s511_s26 = scalar_lea.vmem %s416_s2, 32 }
  0x10   :  { %471 = vmatmul.mubr.msk.f32.gmra.mrb[2].mxu0 %vm38_vm0, %v19_v12  ;;  %vm405_vm15 = vcmask 1048512   ;;  %p508_p0 = scmp.ne.s32.totalorder %s416_s2, %s507_s25  ;;  %p512_p1 = scmp.lt.s32.totalorder %s416_s2, %s416_s2 }
  0x11   :  { %483 = vmatmul.mubr.msk.f32.gmra.mrb[2].mxu1 %vm38_vm0, %v27_v13  ;;  %473 = vmatprep.mubr.msk.f32.mxu0 %vm38_vm0, %v20_v14  ;;  %p513_p2 = scmp.lt.s32.totalorder %s511_s26, %s507_s25 }
  0x12   :  { %485 = vmatprep.mubr.msk.f32.mxu1 %vm38_vm0, %v28_v15  ;;  %v326_v15 = vsub.s32 %v323_v7, %v634_v60 }
  0x13   :  { %p514_p3 = por %p513_p2, %p512_p1 }
  0x14   :  { %474 = vmatmul.mubr.msk.f32.gmra.mrb[4].mxu0 %vm38_vm0, %v21_v16  ;;  %v344_v16 = vadd.s32 4294967240, %v297_v57 }
  0x15   :  { %486 = vmatmul.mubr.msk.f32.gmra.mrb[4].mxu1 %vm38_vm0, %v29_v17  ;;  %476 = vmatprep.mubr.msk.f32.mxu0 %vm38_vm0, %v22_v18  ;;  %v337_v17 = vadd.s32 4294967248, %v297_v57  ;;  %p515_p4 = pnand %p514_p3, %p508_p0 }
  0x16   :  { %488 = vmatprep.mubr.msk.f32.mxu1 %vm38_vm0, %v30_v19  ;;  %v333_v19 = vsub.s32 %v330_v9, %v634_v60 }
  0x18   :  { %477 = vmatmul.mubr.msk.f32.gmra.mrb[6].mxu0 %vm38_vm0, %v23_v20  ;;  %v351_v20 = vadd.s32 4294967232, %v297_v57 }
  0x19   :  { %489 = vmatmul.mubr.msk.f32.gmra.mrb[6].mxu1 %vm38_vm0, %v31_v21 }
  0xdf   :  { %v469_v24 = vpop.f32.mrb[0].mxu0 }
  0xe0   :  { %v481_v25 = vpop.f32.mrb[0].mxu1  ;;  %v159_v26 = vadd.f32 %v469_v24, %v37_v23  ;;  %v153_v28 = vpop.f32.mrb[1].mxu0  ;;  %v365_v24 = vadd.s32 4294967216, %v297_v57 }
  0xe1   :  { %v199_v27 = vadd.f32 %v481_v25, %v37_v23  ;;  %v193_v29 = vpop.f32.mrb[1].mxu1  ;;  %v154_v32 = vadd.f32 %v153_v28, %v37_v23  ;;  %v347_v28 = vsub.s32 %v344_v16, %v634_v60 }
  0xe2   :  { %252 = vperm.xlu0 %505, %v159_v26   ;;  %v194_v39 = vadd.f32 %v193_v29, %v37_v23  ;;  %v340_v29 = vsub.s32 %v337_v17, %v634_v60 }
  0xe3   :  { %276 = vperm.xlu1 %506, %v199_v27   ;;  %v472_v30 = vpop.f32.mrb[2].mxu0 }
  0xe4   :  { %v484_v31 = vpop.f32.mrb[2].mxu1  ;;  %v169_v33 = vadd.f32 %v472_v30, %v37_v23  ;;  %v163_v34 = vpop.f32.mrb[3].mxu0  ;;  %v372_v30 = vadd.s32 4294967208, %v297_v57 }
  0xe5   :  { %v203_v35 = vpop.f32.mrb[3].mxu1  ;;  %v209_v36 = vadd.f32 %v484_v31, %v37_v23  ;;  %v164_v44 = vadd.f32 %v163_v34, %v37_v23  ;;  %v354_v34 = vsub.s32 %v351_v20, %v634_v60 }
  0xe6   :  { %249 = vperm.xlu0 %505, %v154_v32   ;;  %v204_v45 = vadd.f32 %v203_v35, %v37_v23 }
  0xe7   :  { %258 = vperm.xlu1 %506, %v169_v33   ;;  %v475_v37 = vpop.f32.mrb[4].mxu0  ;;  %v386_v33 = vadd.s32 4294967192, %v297_v57 }
  0xe8   :  { %v487_v38 = vpop.f32.mrb[4].mxu1  ;;  %v173_v40 = vpop.f32.mrb[5].mxu0  ;;  %v179_v48 = vadd.f32 %v475_v37, %v37_v23  ;;  %v361_v37 = vsub.s32 %v358_v22, %v634_v60 }
  0xe9   :  { %v213_v41 = vpop.f32.mrb[5].mxu1  ;;  %v174_v49 = vadd.f32 %v173_v40, %v37_v23  ;;  %v219_v52 = vadd.f32 %v487_v38, %v37_v23  ;;  %v368_v38 = vsub.s32 %v365_v24, %v634_v60 }
  0xea   :  { %273 = vperm.xlu0 %505, %v194_v39   ;;  %v214_v53 = vadd.f32 %v213_v41, %v37_v23 }
  0xeb   :  { %282 = vperm.xlu1 %506, %v209_v36   ;;  %v478_v42 = vpop.f32.mrb[6].mxu0  ;;  %v379_v36 = vadd.s32 4294967200, %v297_v57 }
  0xec   :  { %v490_v43 = vpop.f32.mrb[6].mxu1  ;;  %v183_v46 = vpop.f32.mrb[7].mxu0  ;;  %v189_v50 = vadd.f32 %v478_v42, %v37_v23 }
  0xed   :  { %v223_v47 = vpop.f32.mrb[7].mxu1  ;;  %v184_v51 = vadd.f32 %v183_v46, %v37_v23  ;;  %v229_v54 = vadd.f32 %v490_v43, %v37_v23  ;;  %v400_v43 = vadd.s32 4294967176, %v297_v57 }
  0xee   :  { %279 = vperm.xlu0 %505, %v204_v45   ;;  %v224_v55 = vadd.f32 %v223_v47, %v37_v23  ;;  %v375_v45 = vsub.s32 %v372_v30, %v634_v60  ;;  %v389_v47 = vsub.s32 %v386_v33, %v634_v60 }
  0xef   :  { %255 = vperm.xlu1 %506, %v164_v44   ;;  %v393_v44 = vadd.s32 4294967184, %v297_v57  ;;  %v403_v57 = vsub.s32 %v400_v43, %v634_v60 }
  0xf2   :  { %261 = vperm.xlu0 %505, %v174_v49  }
  0xf3   :  { %264 = vperm.xlu1 %506, %v179_v48  }
  0xf6   :  { %267 = vperm.xlu0 %505, %v184_v51  }
  0xf7   :  { %270 = vperm.xlu1 %506, %v189_v50   ;;  %v382_v50 = vsub.s32 %v379_v36, %v634_v60 }
  0xfa   :  { %285 = vperm.xlu0 %505, %v214_v53  }
  0xfb   :  { %288 = vperm.xlu1 %506, %v219_v52  }
  0xfe   :  { %291 = vperm.xlu0 %505, %v224_v55  }
  0xff   :  { %294 = vperm.xlu1 %506, %v229_v54  }
 0x161   :  { %v253_v59 = vpop.permute.xlu0 %252 }
 0x162   :  { %v632_v58 = vpop.permute.xlu1 %276  ;;  %v306_v10 = vrot.slane %v253_v59, %v305_v2  ;;  %v396_v59 = vsub.s32 %v393_v44, %v634_v60 }
 0x163   :  { %v362_v51 = vrot.slane %v632_v58, %v361_v37 }
 0x165   :  { %v250_v63 = vpop.permute.xlu0 %249 }
 0x166   :  { %v259_v62 = vpop.permute.xlu1 %258  ;;  %v301_v8 = vrot.slane %v250_v63, %v300_v1 }
 0x167   :  { %v320_v23 = vrot.slane %v259_v62, %v319_v11 }
 0x168   :  { %v308_v18 = vsel %vm307_vm1, %v306_v10, %v301_v8 }
 0x169   :  { %v274_v5 = vpop.permute.xlu0 %273 }
 0x16a   :  { %v638_v4 = vpop.permute.xlu1 %282  ;;  %v355_v48 = vrot.slane %v274_v5, %v354_v34 }
 0x16b   :  { %v376_v61 = vrot.slane %v638_v4, %v375_v45 }
 0x16d   :  { %v280_v13 = vpop.permute.xlu0 %279 }
 0x16e   :  { %v256_v12 = vpop.permute.xlu1 %255  ;;  %v369_v55 = vrot.slane %v280_v13, %v368_v38 }
 0x16f   :  { %v313_v14 = vrot.slane %v256_v12, %v312_v6 }
 0x171   :  { %v315_v21 = vsel %vm314_vm2, %v313_v14, %v308_v18  ;;  %v262_v26 = vpop.permute.xlu0 %261 }
 0x172   :  { %v265_v25 = vpop.permute.xlu1 %264  ;;  %v327_v27 = vrot.slane %v262_v26, %v326_v15  ;;  %v322_v32 = vsel %vm321_vm3, %v320_v23, %v315_v21 }
 0x173   :  { %v334_v31 = vrot.slane %v265_v25, %v333_v19 }
 0x174   :  { %v329_v35 = vsel %vm328_vm4, %v327_v27, %v322_v32 }
 0x175   :  { %v268_v40 = vpop.permute.xlu0 %267  ;;  %v336_v46 = vsel %vm335_vm5, %v334_v31, %v329_v35 }
 0x176   :  { %v271_v39 = vpop.permute.xlu1 %270  ;;  %v341_v42 = vrot.slane %v268_v40, %v340_v29 }
 0x177   :  { %v348_v41 = vrot.slane %v271_v39, %v347_v28 }
 0x178   :  { %v343_v49 = vsel %vm342_vm6, %v341_v42, %v336_v46 }
 0x179   :  { %v350_v52 = vsel %vm349_vm7, %v348_v41, %v343_v49  ;;  %v286_v54 = vpop.permute.xlu0 %285 }
 0x17a   :  { %v289_v53 = vpop.permute.xlu1 %288  ;;  %v357_v56 = vsel %vm356_vm8, %v355_v48, %v350_v52  ;;  %v383_v0 = vrot.slane %v286_v54, %v382_v50 }
 0x17b   :  { %v364_v62 = vsel %vm363_vm9, %v362_v51, %v357_v56  ;;  %v390_v1 = vrot.slane %v289_v53, %v389_v47 }
 0x17c   :  { %v371_v63 = vsel %vm370_vm10, %v369_v55, %v364_v62 }
 0x17d   :  { %v378_v58 = vsel %vm377_vm11, %v376_v61, %v371_v63  ;;  %v292_v3 = vpop.permute.xlu0 %291 }
 0x17e   :  { %v295_v2 = vpop.permute.xlu1 %294  ;;  %v385_v5 = vsel %vm384_vm12, %v383_v0, %v378_v58  ;;  %v397_v7 = vrot.slane %v292_v3, %v396_v59 }
 0x17f   :  { %v404_v6 = vrot.slane %v295_v2, %v403_v57  ;;  %v392_v8 = vsel %vm391_vm13, %v390_v1, %v385_v5 }
 0x180   :  { %v399_v60 = vsel %vm398_vm14, %v397_v7, %v392_v8 }
 0x181   :  { %v406_v4 = vsel %vm405_vm15, %v404_v6, %v399_v60 }
 0x182   :  { %408 = vst [vmem:[#allocation3] sm:$0x1] %v406_v4 }
 0x183   :  { %518 = shalt.err (!%p515_p4)
}
 0x184   :  { %s519_s29 = scalar_lea.hbm %s671_s3, 16 }
 0x185   :  { %p520_p5 = scmp.ne.s32.totalorder %s671_s3, %s519_s29  ;;  %p523_p6 = scmp.lt.u32.totalorder %s519_s29, %s671_s3 }
 0x187   :  { %p525_p7 = pnand %p523_p6, %p520_p5 }
 0x189   :  { %528 = shalt.err (!%p525_p7)
}
 0x18a   :  { %418 = dma.vmem_to_hbm [thread:$0]  %s416_s2, 16, %s671_s3, [#allocation4]  }
 0x18b   :  { %529 = dma.done.wait [#allocation4], 16  }
 0x18c   :  { %530 = vsyncadd [#allocation4], 4294967280 }
 0x18d   :  { %422 = vsyncpa [#allocation4], 1 }

</bundles_post_ra>
